<compile_context>
chip_gen: v6e
topology: v6e:2x2x1
jax: 0.10.0
libtpu: 0.0.40
codegen_flags: <defaults>
</compile_context>

<pallas_src>
import functools

import jax
import jax.numpy as jnp
from jax import lax
from jax.experimental import pallas as pl
from jax.experimental.pallas import tpu as pltpu


def _supcon_kernel(anchor_ref, contrast_t_ref, row_lab_ref, col_lab_ref,
                   pos_cnt_ref, out_ref, *, scale, n_valid, col_tile):
    # anchor_ref     : [TM, Dp] bf16  (row tile of contrast_feature, pre-scaled by 1/T)
    # contrast_t_ref : [Dp, Np] bf16  (full padded contrast_feature, transposed, resident)
    # row_lab_ref    : [TM, 1]  i32   (labels for this anchor tile)
    # col_lab_ref    : [1, Np]  i32   (labels for all contrast columns)
    # pos_cnt_ref    : [TM, 1]  f32   (analytic number of positives per anchor)
    # out_ref        : [TM, 1]  f32   (per-anchor loss; padded rows zeroed)
    i = pl.program_id(0)
    tm = anchor_ref.shape[0]
    np_ = contrast_t_ref.shape[1]
    n_chunks = np_ // col_tile

    a = anchor_ref[...]                                              # [TM, Dp] bf16
    row_gid = i * tm + lax.broadcasted_iota(jnp.int32, (tm, 1), 0)   # [TM, 1]
    row_lab = row_lab_ref[...]                                       # [TM, 1]

    neg_big = jnp.float32(-1e30)
    m0 = jnp.full((tm, 1), neg_big, dtype=jnp.float32)   # running row max
    l0 = jnp.zeros((tm, 1), dtype=jnp.float32)           # running sum exp (no diag)
    p0 = jnp.zeros((tm, 1), dtype=jnp.float32)           # running sum(pos * logits)

    def body(j, carry):
        m_old, l_old, pos_old = carry
        start = pl.multiple_of(j * col_tile, col_tile)

        c = contrast_t_ref[:, pl.ds(start, col_tile)]                # [Dp, TN] bf16
        # logits chunk = (anchor/T) . contrast^T, f32 MXU accumulation.
        s = lax.dot_general(a, c, dimension_numbers=(((1,), (0,)), ((), ())),
                            preferred_element_type=jnp.float32)      # [TM, TN]

        col_gid = start + lax.broadcasted_iota(jnp.int32, (1, col_tile), 1)
        col_lab = col_lab_ref[:, pl.ds(start, col_tile)]             # [1, TN]
        col_valid = col_gid < n_valid                                # [1, TN]
        not_diag = row_gid != col_gid                                # [TM, TN]
        denom_keep = not_diag & col_valid                            # [TM, TN]
        pos_keep = (row_lab == col_lab) & denom_keep                 # [TM, TN]

        # Row max includes the diagonal (as in PyTorch); padded columns excluded.
        chunk_max = jnp.max(jnp.where(col_valid, s, neg_big), axis=1, keepdims=True)
        m_new = jnp.maximum(m_old, chunk_max)                        # [TM, 1]
        alpha = jnp.exp(m_old - m_new)                               # [TM, 1]
        e = jnp.where(denom_keep, jnp.exp(s - m_new), 0.0)           # [TM, TN]
        l_new = l_old * alpha + jnp.sum(e, axis=1, keepdims=True)
        pos_new = pos_old + jnp.sum(jnp.where(pos_keep, s, 0.0),
                                    axis=1, keepdims=True)
        return m_new, l_new, pos_new

    m, l, pos_dot = lax.fori_loop(0, n_chunks, body, (m0, l0, p0),
                                  unroll=(n_chunks <= 4))

    # mean_i log p_i over positives = sum(pos*logits)/cnt - (row_max + log sum exp)
    log_denom = m + jnp.log(l)                                       # [TM, 1]
    mean_log_prob_pos = pos_dot / pos_cnt_ref[...] - log_denom       # [TM, 1]
    per_anchor = jnp.float32(scale) * mean_log_prob_pos              # [TM, 1]

    # Zero out padded anchor rows.
    row_valid = row_gid < n_valid
    per_anchor = jnp.where(row_valid, per_anchor, jnp.float32(0.0))
    out_ref[...] = per_anchor


def supcon_loss(features, labels=None, mask=None, temperature=0.07,
                contrast_mode='all', base_temperature=0.07, tile_m=None,
                col_tile_hint=512):
    """JAX/Pallas equivalent of SupConLoss.forward (contrast_mode='all')."""
    if features.ndim < 3:
        raise ValueError('`features` needs to be [bsz, n_views, ...]')
    if features.ndim > 3:
        features = features.reshape(features.shape[0], features.shape[1], -1)
    if contrast_mode != 'all':
        # TODO(synk): contrast_mode='one' not implemented.
        raise ValueError('only contrast_mode="all" is implemented')

    bsz, n_views, dim = features.shape

    if labels is not None and mask is not None:
        raise ValueError('Cannot define both `labels` and `mask`')
    if mask is not None:
        # TODO(synk): arbitrary [bsz,bsz] mask argument not supported by the
        # label-based in-kernel mask path.
        raise NotImplementedError('explicit `mask` argument not supported')
    if labels is None:
        # SimCLR case: identity mask == "every sample is its own class".
        labels = jnp.arange(bsz, dtype=jnp.int32)
    labels = jnp.asarray(labels).reshape(-1).astype(jnp.int32)
    if labels.shape[0] != bsz:
        raise ValueError('Num of labels does not match num of features')

    n = n_views * bsz

    # --- tile sizes -----------------------------------------------------------
    if tile_m is None:
        tile_m = 128
        try:
            info = pltpu.get_tpu_info()
            # 128-MiB VMEM parts (v5e/v6e): bigger anchor tiles; v7x (64 MiB): 128.
            if getattr(info, "vmem_capacity_bytes", 0) >= (96 << 20):
                tile_m = 256
        except Exception:
            tile_m = 128
    # Don't over-pad tiny batches.
    tile_m = int(min(tile_m, pl.cdiv(n, 128) * 128))

    n_tiles = pl.cdiv(n, tile_m)
    n_pad = n_tiles * tile_m

    # Column chunk: largest of {col_tile_hint, 256, 128} that divides n_pad
    # (n_pad is always a multiple of 128).  Multiple of 256 keeps v6e/v7x MXU full.
    if n_pad % col_tile_hint == 0:
        col_tile = int(col_tile_hint)
    elif n_pad % 256 == 0:
        col_tile = 256
    else:
        col_tile = 128

    # Pad the feature dim to a multiple of 128 (MXU contraction width).
    dpad = int(pl.cdiv(dim, 128) * 128)

    # --- operands -------------------------------------------------------------
    inv_t = 1.0 / float(temperature)
    # contrast_feature rows: index = v*bsz + b  (== torch.cat(torch.unbind(f,1),0))
    contrast = jnp.transpose(features, (1, 0, 2)).reshape(n, dim).astype(jnp.float32)
    contrast = jnp.pad(contrast, ((0, n_pad - n), (0, dpad - dim)))      # [Np, Dp]
    anchor_bf16 = (contrast * jnp.float32(inv_t)).astype(jnp.bfloat16)   # [Np, Dp]
    contrast_t_bf16 = jnp.transpose(contrast.astype(jnp.bfloat16))       # [Dp, Np]

    lab_n = jnp.tile(labels, (n_views,))                                 # [N]
    lab_pad = jnp.pad(lab_n, (0, n_pad - n), constant_values=-1)         # sentinel
    row_lab = lab_pad.reshape(n_pad, 1)                                  # [Np, 1]
    col_lab = lab_pad.reshape(1, n_pad)                                  # [1, Np]

    # Analytic positives per anchor: n_views * (#same-label samples) - 1.
    class_cnt = jnp.sum((labels[:, None] == labels[None, :]).astype(jnp.float32),
                        axis=1)                                          # [bsz]
    pos_cnt = n_views * class_cnt - 1.0                                  # [bsz]
    pos_cnt = jnp.tile(pos_cnt, (n_views,))                              # [N]
    pos_cnt = jnp.pad(pos_cnt, (0, n_pad - n),
                      constant_values=1.0).reshape(n_pad, 1)             # [Np, 1]

    kernel = functools.partial(
        _supcon_kernel,
        scale=float(-(temperature / base_temperature)),
        n_valid=int(n),
        col_tile=int(col_tile))

    # VMEM budget: resident bf16 contrast (double-buffered by default), bf16
    # anchor tiles, col labels, ~4 live [TM, TN] f32 temporaries + headroom.
    est = (4 * n_pad * dpad          # contrast_t bf16 x 2 buffers
           + 4 * tile_m * dpad       # anchor bf16 x 2 buffers
           + 8 * n_pad               # col labels x 2 buffers
           + 16 * tile_m * col_tile  # ~4 live [TM, TN] f32 temporaries
           + (8 << 20))
    vmem_limit = int(min(max(est, 16 << 20), 48 << 20))

    grid_spec = pltpu.PrefetchScalarGridSpec(
        num_scalar_prefetch=0,
        grid=(n_tiles,),
        in_specs=[
            pl.BlockSpec((tile_m, dpad), lambda i: (i, 0)),   # anchor row tile (bf16)
            pl.BlockSpec((dpad, n_pad), lambda i: (0, 0)),    # contrast^T (resident, bf16)
            pl.BlockSpec((tile_m, 1), lambda i: (i, 0)),      # anchor labels
            pl.BlockSpec((1, n_pad), lambda i: (0, 0)),       # contrast labels
            pl.BlockSpec((tile_m, 1), lambda i: (i, 0)),      # positives count
        ],
        out_specs=pl.BlockSpec((tile_m, 1), lambda i: (i, 0)),
    )

    per_anchor = pl.pallas_call(
        kernel,
        out_shape=jax.ShapeDtypeStruct((n_pad, 1), jnp.float32),
        grid_spec=grid_spec,
        compiler_params=pltpu.CompilerParams(
            dimension_semantics=("parallel",),
            vmem_limit_bytes=vmem_limit),
    )(anchor_bf16, contrast_t_bf16, row_lab, col_lab, pos_cnt)

    # Mean over the N real anchors (== loss.view(anchor_count, bsz).mean()).
    return jnp.sum(per_anchor) / jnp.float32(n)


def _supcon_loss_ref(features, labels, temperature=0.07, base_temperature=0.07,
                     use_bf16_matmul=False):
    """Pure-JAX reference mirroring the PyTorch code (optionally with the same
    bf16 MXU operands as the kernel, for a tight numerical check)."""
    bsz, n_views, dim = features.shape
    labels = labels.reshape(-1, 1)
    base_mask = (labels == labels.T).astype(jnp.float32)
    contrast = jnp.transpose(features, (1, 0, 2)).reshape(
        n_views * bsz, dim).astype(jnp.float32)
    if use_bf16_matmul:
        a = (contrast * (1.0 / temperature)).astype(jnp.bfloat16)
        c = contrast.astype(jnp.bfloat16)
        logits = lax.dot_general(a, c, (((1,), (1,)), ((), ())),
                                 preferred_element_type=jnp.float32)
    else:
        logits = contrast @ contrast.T / temperature
    logits = logits - jnp.max(logits, axis=1, keepdims=True)
    n = n_views * bsz
    logits_mask = 1.0 - jnp.eye(n, dtype=jnp.float32)
    mask = jnp.tile(base_mask, (n_views, n_views)) * logits_mask
    exp_logits = jnp.exp(logits) * logits_mask
    log_prob = logits - jnp.log(exp_logits.sum(1, keepdims=True))
    mean_log_prob_pos = (mask * log_prob).sum(1) / mask.sum(1)
    loss = -(temperature / base_temperature) * mean_log_prob_pos
    return loss.reshape(n_views, bsz).mean()


if __name__ == "__main__":
    key = jax.random.PRNGKey(0)
    k_feat, k_lab = jax.random.split(key)

    bsz, n_views, dim = 8, 2, 32
    feats = jax.random.normal(k_feat, (bsz, n_views, dim), dtype=jnp.float32)
    # L2-normalize feature vectors (standard for SupCon inputs)
    feats = feats / jnp.linalg.norm(feats, axis=-1, keepdims=True)
    labels = jax.random.randint(k_lab, (bsz,), 0, 4)

    loss = supcon_loss(feats, labels=labels)
    loss = jax.block_until_ready(loss)

    # Tight check vs a reference using the same bf16 MXU operands as the kernel.
    ref_bf16 = _supcon_loss_ref(feats, labels, use_bf16_matmul=True)
    assert jnp.allclose(loss, ref_bf16, rtol=1e-3, atol=1e-3), (loss, ref_bf16)

    # Loose check vs the exact-f32 PyTorch-equivalent math (bf16 matmul tolerance).
    ref_f32 = _supcon_loss_ref(feats, labels, use_bf16_matmul=False)
    assert jnp.allclose(loss, ref_f32, rtol=5e-2, atol=5e-2), (loss, ref_f32)

    # SimCLR path (labels=None, mask=None) == labels = arange(bsz).
    loss_simclr = jax.block_until_ready(supcon_loss(feats))
    ref_simclr = _supcon_loss_ref(feats, jnp.arange(bsz), use_bf16_matmul=False)
    assert jnp.allclose(loss_simclr, ref_simclr, rtol=5e-2, atol=5e-2), (
        loss_simclr, ref_simclr)

    print("KERNEL_OK")
</pallas_src>

<mosaic_0001>
module attributes {stable_mosaic.version = 11 : i64} {
  func.func @_supcon_kernel(%arg0: i32, %arg1: memref<128x128xbf16, #tpu.memory_space<vmem>>, %arg2: memref<128x128xbf16, #tpu.memory_space<vmem>>, %arg3: memref<128x1xi32, #tpu.memory_space<vmem>>, %arg4: memref<1x128xi32, #tpu.memory_space<vmem>>, %arg5: memref<128x1xf32, #tpu.memory_space<vmem>>, %arg6: memref<128x1xf32, #tpu.memory_space<vmem>>) attributes {dimension_semantics = [#tpu.dimension_semantics<parallel>], iteration_bounds = array<i64: 1>, scalar_prefetch = 0 : i64, scratch_operands = 0 : i64, tpu.core_type = #tpu.core_type<tc>, window_params = [{transform_indices = @transform_0, window_bounds = array<i64: 128, 128>}, {pipeline_mode = #tpu.pipeline_mode<synchronous>, transform_indices = @transform_1, window_bounds = array<i64: 128, 128>}, {transform_indices = @transform_2, window_bounds = array<i64: 128, 1>}, {pipeline_mode = #tpu.pipeline_mode<synchronous>, transform_indices = @transform_3, window_bounds = array<i64: 1, 128>}, {transform_indices = @transform_4, window_bounds = array<i64: 128, 1>}, {transform_indices = @transform_5, window_bounds = array<i64: 128, 1>}]} {
    %c0 = arith.constant 0 : index
    %c0_0 = arith.constant 0 : index
    %0 = vector.load %arg1[%c0, %c0_0] : memref<128x128xbf16, #tpu.memory_space<vmem>>, vector<128x128xbf16>
    %c128_i32 = arith.constant 128 : i32
    %1 = arith.muli %arg0, %c128_i32 : i32
    %2 = tpu.iota {dimensions = array<i32: 0>} : vector<128x1xi32>
    %3 = vector.broadcast %1 : i32 to vector<128x1xi32>
    %4 = arith.addi %3, %2 : vector<128x1xi32>
    %c0_1 = arith.constant 0 : index
    %c0_2 = arith.constant 0 : index
    %5 = vector.load %arg3[%c0_1, %c0_2] : memref<128x1xi32, #tpu.memory_space<vmem>>, vector<128x1xi32>
    %cst = arith.constant -1.000000e+30 : f32
    %6 = vector.broadcast %cst : f32 to vector<128x1xf32>
    %cst_3 = arith.constant 0.000000e+00 : f32
    %7 = vector.broadcast %cst_3 : f32 to vector<128x1xf32>
    %cst_4 = arith.constant 0.000000e+00 : f32
    %8 = vector.broadcast %cst_4 : f32 to vector<128x1xf32>
    %cst_5 = arith.constant -1.000000e+30 : f32
    %c0_i32 = arith.constant 0 : i32
    %c128_i32_6 = arith.constant 128 : i32
    %9 = arith.muli %c0_i32, %c128_i32_6 : i32
    %10 = tpu.assume_multiple %9, 128 : i32
    %c0_7 = arith.constant 0 : index
    %11 = arith.index_cast %10 : i32 to index
    %12 = vector.load %arg2[%c0_7, %11] : memref<128x128xbf16, #tpu.memory_space<vmem>>, vector<128x128xbf16>
    %cst_8 = arith.constant dense<0.000000e+00> : vector<128x128xf32>
    %13 = tpu.matmul %0, %12, %cst_8 {dimension_numbers = #tpu.dot_dimension_numbers<[1], [0], [0], [1], [0, 0, 1, 1], [], []>} : vector<128x128xbf16>, vector<128x128xbf16>, vector<128x128xf32> -> vector<128x128xf32>
    %14 = tpu.iota {dimensions = array<i32: 1>} : vector<1x128xi32>
    %15 = vector.broadcast %10 : i32 to vector<1x128xi32>
    %16 = arith.addi %15, %14 : vector<1x128xi32>
    %c0_9 = arith.constant 0 : index
    %17 = arith.index_cast %10 : i32 to index
    %18 = vector.load %arg4[%c0_9, %17] : memref<1x128xi32, #tpu.memory_space<vmem>>, vector<1x128xi32>
    %c16_i32 = arith.constant 16 : i32
    %19 = vector.broadcast %c16_i32 : i32 to vector<1x128xi32>
    %20 = arith.cmpi slt, %16, %19 : vector<1x128xi32>
    %21 = vector.broadcast %4 : vector<128x1xi32> to vector<128x128xi32>
    %22 = vector.broadcast %16 : vector<1x128xi32> to vector<128x128xi32>
    %23 = arith.cmpi ne, %21, %22 : vector<128x128xi32>
    %24 = vector.broadcast %20 : vector<1x128xi1> to vector<128x128xi1>
    %25 = arith.andi %23, %24 : vector<128x128xi1>
    %26 = vector.broadcast %5 : vector<128x1xi32> to vector<128x128xi32>
    %27 = vector.broadcast %18 : vector<1x128xi32> to vector<128x128xi32>
    %28 = arith.cmpi eq, %26, %27 : vector<128x128xi32>
    %29 = arith.andi %28, %25 : vector<128x128xi1>
    %30 = vector.shape_cast %20 : vector<1x128xi1> to vector<1x128xi1>
    %31 = vector.broadcast %30 : vector<1x128xi1> to vector<128x128xi1>
    %32 = vector.broadcast %cst_5 : f32 to vector<128x128xf32>
    %33 = arith.select %31, %13, %32 : vector<128x128xi1>, vector<128x128xf32>
    %cst_10 = arith.constant dense<0xFF800000> : vector<128xf32>
    %34 = vector.multi_reduction <maximumf>, %33, %cst_10 [1] : vector<128x128xf32> to vector<128xf32>
    %35 = vector.shape_cast %34 : vector<128xf32> to vector<128x1xf32>
    %36 = arith.maximumf %6, %35 : vector<128x1xf32>
    %37 = arith.subf %6, %36 : vector<128x1xf32>
    %38 = math.exp %37 : vector<128x1xf32>
    %39 = vector.broadcast %36 : vector<128x1xf32> to vector<128x128xf32>
    %40 = arith.subf %13, %39 : vector<128x128xf32>
    %41 = math.exp %40 : vector<128x128xf32>
    %cst_11 = arith.constant 0.000000e+00 : f32
    %42 = vector.broadcast %cst_11 : f32 to vector<128x128xf32>
    %43 = arith.select %25, %41, %42 : vector<128x128xi1>, vector<128x128xf32>
    %44 = arith.mulf %7, %38 : vector<128x1xf32>
    %cst_12 = arith.constant dense<0.000000e+00> : vector<128xf32>
    %45 = vector.multi_reduction <add>, %43, %cst_12 [1] : vector<128x128xf32> to vector<128xf32>
    %46 = vector.shape_cast %45 : vector<128xf32> to vector<128x1xf32>
    %47 = arith.addf %44, %46 : vector<128x1xf32>
    %cst_13 = arith.constant 0.000000e+00 : f32
    %48 = vector.broadcast %cst_13 : f32 to vector<128x128xf32>
    %49 = arith.select %29, %13, %48 : vector<128x128xi1>, vector<128x128xf32>
    %cst_14 = arith.constant dense<0.000000e+00> : vector<128xf32>
    %50 = vector.multi_reduction <add>, %49, %cst_14 [1] : vector<128x128xf32> to vector<128xf32>
    %51 = vector.shape_cast %50 : vector<128xf32> to vector<128x1xf32>
    %52 = arith.addf %8, %51 : vector<128x1xf32>
    %c1_i32 = arith.constant 1 : i32
    %53 = math.log %47 : vector<128x1xf32>
    %54 = arith.addf %36, %53 : vector<128x1xf32>
    %c0_15 = arith.constant 0 : index
    %c0_16 = arith.constant 0 : index
    %55 = vector.load %arg5[%c0_15, %c0_16] : memref<128x1xf32, #tpu.memory_space<vmem>>, vector<128x1xf32>
    %56 = arith.divf %52, %55 : vector<128x1xf32>
    %57 = arith.subf %56, %54 : vector<128x1xf32>
    %cst_17 = arith.constant -1.000000e+00 : f32
    %58 = vector.broadcast %cst_17 : f32 to vector<128x1xf32>
    %59 = arith.mulf %58, %57 : vector<128x1xf32>
    %c16_i32_18 = arith.constant 16 : i32
    %60 = vector.broadcast %c16_i32_18 : i32 to vector<128x1xi32>
    %61 = arith.cmpi slt, %4, %60 : vector<128x1xi32>
    %cst_19 = arith.constant 0.000000e+00 : f32
    %62 = vector.broadcast %cst_19 : f32 to vector<128x1xf32>
    %63 = arith.select %61, %59, %62 : vector<128x1xi1>, vector<128x1xf32>
    %c0_20 = arith.constant 0 : index
    %c0_21 = arith.constant 0 : index
    %64 = vector.load %arg6[%c0_20, %c0_21] : memref<128x1xf32, #tpu.memory_space<vmem>>, vector<128x1xf32>
    tpu.vector_store %arg6[%c0_20, %c0_21], %63 {strides = array<i32>} : memref<128x1xf32, #tpu.memory_space<vmem>>, vector<128x1xf32>,
    return
  }
  func.func @transform_0(%arg0: i32) -> (i32, i32) {
    %c0_i32 = arith.constant 0 : i32
    %c0_i32_0 = arith.constant 0 : i32
    return %arg0, %c0_i32 : i32, i32
  }
  func.func @transform_1(%arg0: i32) -> (i32, i32) {
    %c0_i32 = arith.constant 0 : i32
    %c0_i32_0 = arith.constant 0 : i32
    %c0_i32_1 = arith.constant 0 : i32
    return %c0_i32, %c0_i32_0 : i32, i32
  }
  func.func @transform_2(%arg0: i32) -> (i32, i32) {
    %c0_i32 = arith.constant 0 : i32
    %c0_i32_0 = arith.constant 0 : i32
    return %arg0, %c0_i32 : i32, i32
  }
  func.func @transform_3(%arg0: i32) -> (i32, i32) {
    %c0_i32 = arith.constant 0 : i32
    %c0_i32_0 = arith.constant 0 : i32
    %c0_i32_1 = arith.constant 0 : i32
    return %c0_i32, %c0_i32_0 : i32, i32
  }
  func.func @transform_4(%arg0: i32) -> (i32, i32) {
    %c0_i32 = arith.constant 0 : i32
    %c0_i32_0 = arith.constant 0 : i32
    return %arg0, %c0_i32 : i32, i32
  }
  func.func @transform_5(%arg0: i32) -> (i32, i32) {
    %c0_i32 = arith.constant 0 : i32
    %c0_i32_0 = arith.constant 0 : i32
    return %arg0, %c0_i32 : i32, i32
  }
}

</mosaic_0001>

<bundles_post_ra>
// kernel: tpu_custom_call.1
= control target key start
LH: loop header
LB: loop body
LE: loop exit
PB: predicated region body
PF: predicated region fallthrough
CT: control target
= control target key end

     0   :  { %v1023_v1 = vmov 0   ;;  %v38_v13 = vlaneseq  ;;  %vm885_vm9 = vcmask 7168   ;;  %v1024_v58 = vmov 0.0   ;;  %s1198_s1 = inlined_call_operand.vmem [shape: bf16[128,128], index: 1, kind: input, shape index: {}]   ;;  %s1199_s0 = inlined_call_operand.vmem [shape: bf16[128,128], index: 0, kind: input, shape index: {}]   ;;  %s1200_s2 = inlined_call_operand.vmem [shape: s32[128,1], index: 2, kind: input, shape index: {}]   ;;  %s1201_s3 = inlined_call_operand.vmem [shape: s32[1,128], index: 3, kind: input, shape index: {}]   ;;  %s1202_s5 = inlined_call_operand.vmem [shape: f32[128,1], index: 5, kind: output, shape index: {}]   ;;  %s1203_s4 = inlined_call_operand.vmem [shape: f32[128,1], index: 4, kind: input, shape index: {}]  }
   0x1   :  { %v991_v0 = vld [vmem:[%s1198_s1 + $0x38] sm:$0xff]   ;;  %989 = vset.pattern.permute.xlu1 %v1023_v1  ;;  %990 = vset.pattern.permute.xlu0 %v1023_v1  ;;  %v992_v2 = vld [vmem:[%s1198_s1 + $0x30] sm:$0xff]   ;;  %v993_v3 = vld [vmem:[%s1198_s1 + $0x28] sm:$0xff]   ;;  %888 = vst.msk [vmem:[%s1202_s5 + $0x10] sm:$0xff] %vm885_vm9, %v1024_v58 }
   0x2   :  { %939 = vmatprep.subr.bf16.mxu0 %v991_v0  ;;  %971 = vmatprep.subr.bf16.mxu1 %v991_v0  ;;  %v994_v4 = vld [vmem:[%s1198_s1 + $0x20] sm:$0xff]   ;;  %v995_v6 = vld [vmem:[%s1198_s1 + $0x18] sm:$0xff]   ;;  %v73_v8 = vld [vmem:[%s1200_s2 + $0x8] sm:$0xff]  ;;  %v298_v14 = vand.u32 127, %v38_v13  ;;  %v39_v15 = vshrl.u32 %v38_v13, 7  ;;  %889 = vst.msk [vmem:[%s1202_s5 + $0x18] sm:$0xff] %vm885_vm9, %v1024_v58 }
   0x3   :  { %940 = vmatpush3.bf16.msra.mxu0 %v991_v0  ;;  %979 = vmatpush3.bf16.msra.mxu1 %v991_v0  ;;  %v999_v5 = vld [vmem:[%s1199_s0] sm:$0xff]   ;;  %v996_v9 = vld [vmem:[%s1198_s1 + $0x10] sm:$0xff]   ;;  %v997_v10 = vld [vmem:[%s1198_s1 + $0x8] sm:$0xff]   ;;  %890 = vst.msk [vmem:[%s1202_s5 + $0x20] sm:$0xff] %vm885_vm9, %v1024_v58 }
   0x4   :  { %941 = vmatprep.subr.bf16.mxu0 %v992_v2  ;;  %972 = vmatprep.subr.bf16.mxu1 %v992_v2  ;;  %v72_v7 = vld [vmem:[%s1200_s2] sm:$0xff]  ;;  %v1000_v12 = vld [vmem:[%s1199_s0 + $0x8] sm:$0xff]   ;;  %vm303_vm0 = vcmp.ne.s32.totalorder %v39_v15, %v298_v14  ;;  %v40_v16 = vadd.s32 8, %v39_v15  ;;  %v1003_v19 = vld [vmem:[%s1199_s0 + $0x10] sm:$0xff]   ;;  %vm302_vm2 = vcmp.lt.s32.totalorder %v298_v14, 16  ;;  %891 = vst.msk [vmem:[%s1202_s5 + $0x28] sm:$0xff] %vm885_vm9, %v1024_v58 }
   0x5   :  { %955 = vmatprep.mubr.bf16.mxu0 %v999_v5  ;;  %338 = vperm.xlu1 %989, %v72_v7   ;;  %v998_v11 = vld [vmem:[%s1198_s1] sm:$0xff]   ;;  %v1002_v18 = vld [vmem:[%s1199_s0 + $0x28] sm:$0xff]   ;;  %v1004_v20 = vld [vmem:[%s1199_s0 + $0x30] sm:$0xff]   ;;  %892 = vst.msk [vmem:[%s1202_s5 + $0x30] sm:$0xff] %vm885_vm9, %v1024_v58 }
   0x6   :  { %vm304_vm1 = vcmp.ne.s32.totalorder %v40_v16, %v298_v14  ;;  %v1001_v17 = vld [vmem:[%s1199_s0 + $0x20] sm:$0xff]   ;;  %v1005_v21 = vld [vmem:[%s1199_s0 + $0x18] sm:$0xff]   ;;  %vm321_vm4 = vmand %vm303_vm0, %vm302_vm2  ;;  %893 = vst.msk [vmem:[%s1202_s5 + $0x38] sm:$0xff] %vm885_vm9, %v1024_v58 }
   0x7   :  { %942 = vmatpush3.bf16.msra.mxu0 %v992_v2  ;;  %980 = vmatpush3.bf16.msra.mxu1 %v992_v2  ;;  %v1006_v22 = vld [vmem:[%s1199_s0 + $0x38] sm:$0xff]   ;;  %v922_v50 = vld [vmem:[%s1201_s3] ss:$0 sm:$0xff]  ;;  %vm322_vm7 = vmand %vm304_vm1, %vm302_vm2  ;;  %894 = vst.msk [vmem:[%s1202_s5 + $0x40] sm:$0xff] %vm885_vm9, %v1024_v58 }
   0x8   :  { %943 = vmatprep.subr.bf16.mxu0 %v993_v3  ;;  %973 = vmatprep.subr.bf16.mxu1 %v993_v3  ;;  %895 = vst.msk [vmem:[%s1202_s5 + $0x48] sm:$0xff] %vm885_vm9, %v1024_v58  ;;  %896 = vst.msk [vmem:[%s1202_s5 + $0x50] sm:$0xff] %vm885_vm9, %v1024_v58  ;;  %v773_v1 = vld [vmem:[%s1203_s4] sm:$0xff] }
   0x9   :  { %341 = vperm.xlu1 %989, %v73_v8   ;;  %963 = vmatprep.mubr.bf16.mxu1 %v1001_v17  ;;  %897 = vst.msk [vmem:[%s1202_s5 + $0x58] sm:$0xff] %vm885_vm9, %v1024_v58  ;;  %898 = vst.msk [vmem:[%s1202_s5 + $0x60] sm:$0xff] %vm885_vm9, %v1024_v58 }
   0xa   :  { %899 = vst.msk [vmem:[%s1202_s5 + $0x68] sm:$0xff] %vm885_vm9, %v1024_v58  ;;  %900 = vst.msk [vmem:[%s1202_s5 + $0x70] sm:$0xff] %vm885_vm9, %v1024_v58 }
   0xb   :  { %944 = vmatpush3.bf16.msra.mxu0 %v993_v3  ;;  %981 = vmatpush3.bf16.msra.mxu1 %v993_v3  ;;  %901 = vst.msk [vmem:[%s1202_s5 + $0x78] sm:$0xff] %vm885_vm9, %v1024_v58 }
   0xc   :  { %945 = vmatprep.subr.bf16.mxu0 %v994_v4  ;;  %974 = vmatprep.subr.bf16.mxu1 %v994_v4 }
   0xf   :  { %946 = vmatpush3.bf16.msra.mxu0 %v994_v4  ;;  %982 = vmatpush3.bf16.msra.mxu1 %v994_v4 }
  0x10   :  { %947 = vmatprep.subr.bf16.mxu0 %v995_v6  ;;  %975 = vmatprep.subr.bf16.mxu1 %v995_v6 }
  0x13   :  { %948 = vmatpush3.bf16.msra.mxu0 %v995_v6  ;;  %983 = vmatpush3.bf16.msra.mxu1 %v995_v6  ;;  %v774_v6 = vld [vmem:[%s1203_s4 + $0x8] sm:$0xff] }
  0x14   :  { %949 = vmatprep.subr.bf16.mxu0 %v996_v9  ;;  %976 = vmatprep.subr.bf16.mxu1 %v996_v9 }
  0x17   :  { %950 = vmatpush3.bf16.msra.mxu0 %v996_v9  ;;  %984 = vmatpush3.bf16.msra.mxu1 %v996_v9 }
  0x18   :  { %951 = vmatprep.subr.bf16.mxu0 %v997_v10  ;;  %977 = vmatprep.subr.bf16.mxu1 %v997_v10 }
  0x1b   :  { %952 = vmatpush3.bf16.msra.mxu0 %v997_v10  ;;  %985 = vmatpush3.bf16.msra.mxu1 %v997_v10 }
  0x1c   :  { %953 = vmatprep.subr.bf16.mxu0 %v998_v11  ;;  %978 = vmatprep.subr.bf16.mxu1 %v998_v11 }
  0x1f   :  { %954 = vmatpush3.bf16.msra.mxu0 %v998_v11  ;;  %986 = vmatpush3.bf16.msra.mxu1 %v998_v11 }
  0x22   :  { %956 = vmatmul.mubr.bf16.vlgmr.msra.gmra.mxu0 %v1000_v12  ;;  %964 = vmatmul.mubr.bf16.vlgmr.msra.gmra.mxu1 %v1002_v18 }
  0x23   :  { %959 = vmatprep.mubr.bf16.mxu0 %v1003_v19  ;;  %967 = vmatprep.mubr.bf16.mxu1 %v1004_v20 }
  0x2a   :  { %960 = vmatmul.mubr.bf16.gmra.mxu0 %v1005_v21  ;;  %968 = vmatmul.mubr.bf16.gmra.mxu1 %v1006_v22 }
  0x80   :  { %v339_v49 = vpop.permute.xlu1 %338 }
  0x81   :  { %vm389_vm3 = vcmp.eq.s32.totalorder %v339_v49, %v922_v50 }
  0x82   :  { %vm405_vm5 = vmand %vm389_vm3, %vm321_vm4 }
  0x84   :  { %v342_v52 = vpop.permute.xlu1 %341 }
  0x85   :  { %vm390_vm6 = vcmp.eq.s32.totalorder %v342_v52, %v922_v50 }
  0x86   :  { %vm406_vm8 = vmand %vm390_vm6, %vm322_vm7 }
  0xe2   :  { %v957_v23 = vpop.f32.mrf.mxu0  ;;  %v965_v29 = vpop.f32.mrf.mxu1 }
  0xe4   :  { %v234_v24 = vpop.f32.mrf.mxu0  ;;  %v266_v31 = vpop.f32.mrf.mxu1 }
  0xe5   :  { %v421_v25 = vsel %vm302_vm2, %v234_v24, -1e+30  ;;  %v661_v55 = vsel %vm405_vm5, %v234_v24, 0.0 }
  0xe6   :  { %437 = vmax.xlane.f32.xlu0 %v421_v25  ;;  %v958_v26 = vpop.f32.mrf.mxu0  ;;  %v966_v33 = vpop.f32.mrf.mxu1 }
  0xe8   :  { %v237_v27 = vpop.f32.mrf.mxu0  ;;  %v269_v35 = vpop.f32.mrf.mxu1 }
  0xe9   :  { %v422_v28 = vsel %vm302_vm2, %v237_v27, -1e+30  ;;  %v662_v57 = vsel %vm406_vm8, %v237_v27, 0.0 }
  0xea   :  { %439 = vmax.xlane.f32.xlu0 %v422_v28  ;;  %v961_v30 = vpop.f32.mrf.mxu0  ;;  %v969_v37 = vpop.f32.mrf.mxu1 }
  0xec   :  { %v250_v32 = vpop.f32.mrf.mxu0  ;;  %v282_v38 = vpop.f32.mrf.mxu1 }
  0xee   :  { %v962_v34 = vpop.f32.mrf.mxu0  ;;  %v970_v39 = vpop.f32.mrf.mxu1 }
  0xf0   :  { %v253_v36 = vpop.f32.mrf.mxu0  ;;  %v285_v40 = vpop.f32.mrf.mxu1 }
 0x16f   :  { %v438_v41 = vpop.xlane.xlu0 %437 }
 0x170   :  { %v1111_v42 = vmax.f32 %v438_v41, -1e+30 }
 0x172   :  { %v533_v43 = vsub.f32 %v234_v24, %v1111_v42  ;;  %v485_v59 = vsub.f32 -1e+30, %v1111_v42 }
 0x173   :  { %v440_v44 = vpop.xlane.xlu0 %439 }
 0x174   :  { %v549_v45 = vmul.f32 1.442695, %v533_v43  ;;  %v1114_v46 = vmax.f32 %v440_v44, -1e+30  ;;  %v501_v60 = vmul.f32 1.442695, %v485_v59 }
 0x176   :  { %1007 = vpow2.f32 %v549_v45  ;;  %v534_v47 = vsub.f32 %v237_v27, %v1114_v46  ;;  %v486_v61 = vsub.f32 -1e+30, %v1114_v46 }
 0x178   :  { %v551_v48 = vmul.f32 1.442695, %v534_v47  ;;  %v503_v62 = vmul.f32 1.442695, %v486_v61 }
 0x17a   :  { %1009 = vpow2.f32 %v551_v48 }
 0x17b   :  { %1011 = vpow2.f32 %v501_v60 }
 0x17c   :  { %1013 = vpow2.f32 %v503_v62 }
 0x17d   :  { %1015 = vrcp.f32 %v773_v1 }
 0x183   :  { %v1008_v51 = vpop.eup %1007 }
 0x184   :  { %v581_v53 = vsel %vm321_vm4, %v1008_v51, 0.0 }
 0x185   :  { %613 = vadd.xlane.f32.xlu0 %v581_v53 }
 0x187   :  { %v1010_v54 = vpop.eup %1009 }
 0x188   :  { %v582_v56 = vsel %vm322_vm7, %v1010_v54, 0.0  ;;  %v1012_v63 = vpop.eup %1011 }
 0x189   :  { %677 = vadd.xlane.f32.xlu0 %v661_v55  ;;  %615 = vadd.xlane.f32.xlu1 %v582_v56  ;;  %v597_v0 = vmul.f32 0.0, %v1012_v63  ;;  %v1014_v2 = vpop.eup %1013 }
 0x18a   :  { %v598_v5 = vmul.f32 0.0, %v1014_v2  ;;  %v1016_v10 = vpop.eup %1015 }
 0x18d   :  { %679 = vadd.xlane.f32.xlu0 %v662_v57 }
 0x20e   :  { %v614_v3 = vpop.xlane.xlu0 %613 }
 0x20f   :  { %v645_v4 = vadd.f32 %v614_v3, %v597_v0 }
 0x211   :  { %1017 = vlog2.f32 %v645_v4 }
 0x212   :  { %v616_v7 = vpop.xlane.xlu1 %615  ;;  %1019 = vrcp.f32 %v774_v6  ;;  %v678_v9 = vpop.xlane.xlu0 %677 }
 0x213   :  { %v646_v8 = vadd.f32 %v616_v7, %v598_v5  ;;  %v790_v15 = vmul.f32 %v1016_v10, %v678_v9 }
 0x215   :  { %1021 = vlog2.f32 %v646_v8 }
 0x216   :  { %v680_v17 = vpop.xlane.xlu0 %679 }
 0x21e   :  { %v1018_v11 = vpop.eup %1017 }
 0x21f   :  { %v726_v12 = vmul.f32 0.6931472, %v1018_v11  ;;  %v1020_v13 = vpop.eup %1019 }
 0x220   :  { %v792_v22 = vmul.f32 %v1020_v13, %v680_v17 }
 0x221   :  { %v757_v14 = vadd.f32 %v726_v12, %v1111_v42 }
 0x222   :  { %v1022_v16 = vpop.eup %1021 }
 0x223   :  { %v728_v18 = vmul.f32 0.6931472, %v1022_v16  ;;  %v821_v19 = vsub.f32 %v790_v15, %v757_v14 }
 0x225   :  { %v837_v20 = vmul.f32 -1.0, %v821_v19  ;;  %v758_v21 = vadd.f32 %v728_v18, %v1114_v46 }
 0x227   :  { %886 = vst.msk [vmem:[%s1202_s5] sm:$0xff] %vm885_vm9, %v837_v20  ;;  %v822_v23 = vsub.f32 %v792_v22, %v758_v21 }
 0x229   :  { %v838_v24 = vmul.f32 -1.0, %v822_v23 }
 0x22b   :  { %887 = vst.msk [vmem:[%s1202_s5 + $0x8] sm:$0xff] %vm885_vm9, %v838_v24 }

</bundles_post_ra>
